<compile_context>
chip_gen: v5e
topology: v5e:2x2
jax: 0.10.0
libtpu: 0.0.40
codegen_flags: <defaults>
</compile_context>

<pallas_src>
import jax
import jax.numpy as jnp
from jax.experimental import pallas as pl
from jax.experimental.pallas import tpu as pltpu

_LANE = 128
_SUBLANE = 8


def _round_up(n, m):
    return ((n + m - 1) // m) * m


def mlp_relu_kernel(x_ref, w1_ref, b1_ref, w2_ref, b2_ref, o_ref):
    # Layer 1: (tb, in_p) @ (in_p, hid_p) -> (tb, hid_p).  MXU matmul with f32
    # accumulation; bias-add + ReLU on the VPU in f32.
    h = jnp.dot(x_ref[...], w1_ref[...], preferred_element_type=jnp.float32)
    h = jnp.maximum(h + b1_ref[...], 0.0)

    # Layer 2: (tb, hid_p) @ (hid_p, out_p) -> (tb, out_p).
    h = h.astype(w2_ref.dtype)  # bf16 operand path re-quantizes here; f32 is a no-op
    y = jnp.dot(h, w2_ref[...], preferred_element_type=jnp.float32)
    o_ref[...] = jnp.maximum(y + b2_ref[...], 0.0).astype(o_ref.dtype)


def _pick_row_tile(batch, max_rows):
    """Row tile: large (multiple of 8), no divisibility requirement (cdiv grid),
    but small enough that the grid has >= 2 steps when the batch allows — so the
    'parallel' axis can actually shard across v7x's two TensorCores."""
    batch_r = _round_up(batch, _SUBLANE)
    if batch_r >= 2 * max_rows:
        return max_rows
    half = _round_up((batch_r + 1) // 2, _SUBLANE)
    return min(max_rows, max(_SUBLANE, half))


def mlp_relu(x, w1, b1, w2, b2, *, block_rows=256, operand_dtype=None):
    """x: (B, in), w1: (hidden, in), b1: (hidden,), w2: (out, hidden), b2: (out,).

    block_rows: 256 is VMEM-safe on all generations (v7x has 64 MiB/TC); bump to
    512 on v5e/v6e for large batches if the weights are small.
    operand_dtype: set to jnp.bfloat16 on v6e/v7x for ~3x MXU throughput.
    """
    batch, in_f = x.shape
    hidden = w1.shape[0]
    out_f = w2.shape[0]
    out_dtype = x.dtype

    # Lane-pad every feature dim (zero pad => relu numerics stay exact).
    in_p = _round_up(in_f, _LANE)
    hid_p = _round_up(hidden, _LANE)
    out_p = _round_up(out_f, _LANE)

    # One-time HBM-side transpose + pad of the weights; the kernel then
    # contracts (1, 0) on both matmuls -> no per-step XLU transpose.
    w1t = jnp.zeros((in_p, hid_p), w1.dtype).at[:in_f, :hidden].set(w1.T)
    w2t = jnp.zeros((hid_p, out_p), w2.dtype).at[:hidden, :out_f].set(w2.T)
    # Biases as (1, N) f32 tiles (epilogue stays f32 even on the bf16 path).
    b1_2d = jnp.zeros((1, hid_p), jnp.float32).at[0, :hidden].set(b1.astype(jnp.float32))
    b2_2d = jnp.zeros((1, out_p), jnp.float32).at[0, :out_f].set(b2.astype(jnp.float32))

    x_in = x
    if in_p != in_f:
        x_in = jnp.zeros((batch, in_p), x.dtype).at[:, :in_f].set(x)

    if operand_dtype is not None:
        x_in = x_in.astype(operand_dtype)
        w1t = w1t.astype(operand_dtype)
        w2t = w2t.astype(operand_dtype)

    tb = _pick_row_tile(batch, block_rows)
    grid = (pl.cdiv(batch, tb),)

    # Explicit scoped-VMEM budget: streamed x/y tiles (double-buffered),
    # single-buffered resident weights/biases, plus the f32 hidden intermediate.
    x_item = jnp.dtype(x_in.dtype).itemsize
    w_item = jnp.dtype(w1t.dtype).itemsize
    o_item = jnp.dtype(out_dtype).itemsize
    weight_bytes = (in_p * hid_p + hid_p * out_p) * w_item + (hid_p + out_p) * 4
    stream_bytes = 2 * tb * (in_p * x_item + out_p * o_item)
    scratch_bytes = tb * hid_p * 4
    vmem_needed = weight_bytes + stream_bytes + scratch_bytes
    vmem_limit = int(min(max(2 * vmem_needed + (4 << 20), 32 << 20), 64 << 20))

    cost = pl.CostEstimate(
        flops=2 * batch * (in_p * hid_p + hid_p * out_p),
        transcendentals=0,
        bytes_accessed=(batch * in_p * x_item + batch * out_p * o_item
                        + weight_bytes),
    )

    resident = dict(pipeline_mode=pl.Buffered(1))  # never re-DMA'd; 1 buffer

    out_padded = pl.pallas_call(
        mlp_relu_kernel,
        out_shape=jax.ShapeDtypeStruct((batch, out_p), out_dtype),
        grid_spec=pltpu.PrefetchScalarGridSpec(
            num_scalar_prefetch=0,
            grid=grid,
            in_specs=[
                pl.BlockSpec((tb, in_p), lambda i: (i, 0)),                # x: streams
                pl.BlockSpec((in_p, hid_p), lambda i: (0, 0), **resident),  # W1^T resident
                pl.BlockSpec((1, hid_p), lambda i: (0, 0), **resident),     # b1 resident
                pl.BlockSpec((hid_p, out_p), lambda i: (0, 0), **resident), # W2^T resident
                pl.BlockSpec((1, out_p), lambda i: (0, 0), **resident),     # b2 resident
            ],
            out_specs=pl.BlockSpec((tb, out_p), lambda i: (i, 0)),
        ),
        compiler_params=pltpu.CompilerParams(
            dimension_semantics=("parallel",),
            vmem_limit_bytes=vmem_limit,
        ),
        cost_estimate=cost,
    )(x_in, w1t, b1_2d, w2t, b2_2d)

    # Consumers that tolerate a lane-padded (batch, out_p) buffer can skip this
    # slice (it is an extra XLA pass over the output stream).
    return out_padded[:, :out_f] if out_p != out_f else out_padded


def _linear_init(key, out_features, in_features, dtype=jnp.float32):
    """Deterministic PyTorch-style nn.Linear init: U(-1/sqrt(fan_in), 1/sqrt(fan_in))."""
    kw, kb = jax.random.split(key)
    bound = 1.0 / (in_features ** 0.5)
    w = jax.random.uniform(kw, (out_features, in_features), dtype, -bound, bound)
    b = jax.random.uniform(kb, (out_features,), dtype, -bound, bound)
    return w, b


if __name__ == "__main__":
    input_size, hidden_size, output_size = 32, 64, 16
    batch = 8

    key = jax.random.PRNGKey(0)
    k_x, k_l1, k_l2 = jax.random.split(key, 3)

    x = jax.random.normal(k_x, (batch, input_size), jnp.float32)
    w1, b1 = _linear_init(k_l1, hidden_size, input_size)
    w2, b2 = _linear_init(k_l2, output_size, hidden_size)

    y = mlp_relu(x, w1, b1, w2, b2)
    jax.block_until_ready(y)

    # Reference check in plain JAX.
    ref = jnp.maximum(jnp.maximum(x @ w1.T + b1, 0.0) @ w2.T + b2, 0.0)
    assert y.shape == (batch, output_size)
    assert jnp.allclose(y, ref, atol=1e-5, rtol=1e-5)

    print("KERNEL_OK")
</pallas_src>

<mosaic_0001>
module attributes {stable_mosaic.version = 11 : i64} {
  func.func @mlp_relu_kernel(%arg0: i32, %arg1: memref<8x128xf32, #tpu.memory_space<vmem>>, %arg2: memref<128x128xf32, #tpu.memory_space<vmem>>, %arg3: memref<1x128xf32, #tpu.memory_space<vmem>>, %arg4: memref<128x128xf32, #tpu.memory_space<vmem>>, %arg5: memref<1x128xf32, #tpu.memory_space<vmem>>, %arg6: memref<8x128xf32, #tpu.memory_space<vmem>>) attributes {dimension_semantics = [#tpu.dimension_semantics<parallel>], iteration_bounds = array<i64: 1>, scalar_prefetch = 0 : i64, scratch_operands = 0 : i64, tpu.core_type = #tpu.core_type<tc>, window_params = [{transform_indices = @transform_0, window_bounds = array<i64: 8, 128>}, {pipeline_mode = #tpu.pipeline_mode<synchronous>, transform_indices = @transform_1, window_bounds = array<i64: 128, 128>}, {pipeline_mode = #tpu.pipeline_mode<synchronous>, transform_indices = @transform_2, window_bounds = array<i64: 1, 128>}, {pipeline_mode = #tpu.pipeline_mode<synchronous>, transform_indices = @transform_3, window_bounds = array<i64: 128, 128>}, {pipeline_mode = #tpu.pipeline_mode<synchronous>, transform_indices = @transform_4, window_bounds = array<i64: 1, 128>}, {transform_indices = @transform_5, window_bounds = array<i64: 8, 128>}]} {
    %c0 = arith.constant 0 : index
    %c0_0 = arith.constant 0 : index
    %0 = vector.load %arg1[%c0, %c0_0] : memref<8x128xf32, #tpu.memory_space<vmem>>, vector<8x128xf32>
    %c0_1 = arith.constant 0 : index
    %c0_2 = arith.constant 0 : index
    %1 = vector.load %arg2[%c0_1, %c0_2] : memref<128x128xf32, #tpu.memory_space<vmem>>, vector<128x128xf32>
    %cst = arith.constant dense<0.000000e+00> : vector<8x128xf32>
    %2 = tpu.matmul %0, %1, %cst {dimension_numbers = #tpu.dot_dimension_numbers<[1], [0], [0], [1], [0, 0, 1, 1], [], []>} : vector<8x128xf32>, vector<128x128xf32>, vector<8x128xf32> -> vector<8x128xf32>
    %c0_3 = arith.constant 0 : index
    %c0_4 = arith.constant 0 : index
    %3 = vector.load %arg3[%c0_3, %c0_4] : memref<1x128xf32, #tpu.memory_space<vmem>>, vector<1x128xf32>
    %4 = vector.broadcast %3 : vector<1x128xf32> to vector<8x128xf32>
    %5 = arith.addf %2, %4 : vector<8x128xf32>
    %cst_5 = arith.constant 0.000000e+00 : f32
    %6 = vector.broadcast %cst_5 : f32 to vector<8x128xf32>
    %7 = arith.maximumf %5, %6 : vector<8x128xf32>
    %c0_6 = arith.constant 0 : index
    %c0_7 = arith.constant 0 : index
    %8 = vector.load %arg4[%c0_6, %c0_7] : memref<128x128xf32, #tpu.memory_space<vmem>>, vector<128x128xf32>
    %cst_8 = arith.constant dense<0.000000e+00> : vector<8x128xf32>
    %9 = tpu.matmul %7, %8, %cst_8 {dimension_numbers = #tpu.dot_dimension_numbers<[1], [0], [0], [1], [0, 0, 1, 1], [], []>} : vector<8x128xf32>, vector<128x128xf32>, vector<8x128xf32> -> vector<8x128xf32>
    %c0_9 = arith.constant 0 : index
    %c0_10 = arith.constant 0 : index
    %10 = vector.load %arg5[%c0_9, %c0_10] : memref<1x128xf32, #tpu.memory_space<vmem>>, vector<1x128xf32>
    %11 = vector.broadcast %10 : vector<1x128xf32> to vector<8x128xf32>
    %12 = arith.addf %9, %11 : vector<8x128xf32>
    %cst_11 = arith.constant 0.000000e+00 : f32
    %13 = vector.broadcast %cst_11 : f32 to vector<8x128xf32>
    %14 = arith.maximumf %12, %13 : vector<8x128xf32>
    %c0_12 = arith.constant 0 : index
    %c0_13 = arith.constant 0 : index
    %15 = vector.load %arg6[%c0_12, %c0_13] : memref<8x128xf32, #tpu.memory_space<vmem>>, vector<8x128xf32>
    tpu.vector_store %arg6[%c0_12, %c0_13], %14 {strides = array<i32>} : memref<8x128xf32, #tpu.memory_space<vmem>>, vector<8x128xf32>,
    return
  }
  func.func @transform_0(%arg0: i32) -> (i32, i32) {
    %c0_i32 = arith.constant 0 : i32
    %c0_i32_0 = arith.constant 0 : i32
    return %arg0, %c0_i32 : i32, i32
  }
  func.func @transform_1(%arg0: i32) -> (i32, i32) {
    %c0_i32 = arith.constant 0 : i32
    %c0_i32_0 = arith.constant 0 : i32
    %c0_i32_1 = arith.constant 0 : i32
    return %c0_i32, %c0_i32_0 : i32, i32
  }
  func.func @transform_2(%arg0: i32) -> (i32, i32) {
    %c0_i32 = arith.constant 0 : i32
    %c0_i32_0 = arith.constant 0 : i32
    %c0_i32_1 = arith.constant 0 : i32
    return %c0_i32, %c0_i32_0 : i32, i32
  }
  func.func @transform_3(%arg0: i32) -> (i32, i32) {
    %c0_i32 = arith.constant 0 : i32
    %c0_i32_0 = arith.constant 0 : i32
    %c0_i32_1 = arith.constant 0 : i32
    return %c0_i32, %c0_i32_0 : i32, i32
  }
  func.func @transform_4(%arg0: i32) -> (i32, i32) {
    %c0_i32 = arith.constant 0 : i32
    %c0_i32_0 = arith.constant 0 : i32
    %c0_i32_1 = arith.constant 0 : i32
    return %c0_i32, %c0_i32_0 : i32, i32
  }
  func.func @transform_5(%arg0: i32) -> (i32, i32) {
    %c0_i32 = arith.constant 0 : i32
    %c0_i32_0 = arith.constant 0 : i32
    return %arg0, %c0_i32 : i32, i32
  }
}

</mosaic_0001>

<bundles_post_ra>
// kernel: tpu_custom_call.1
= control target key start
LH: loop header
LB: loop body
LE: loop exit
PB: predicated region body
PF: predicated region fallthrough
CT: control target
= control target key end

     0   :  { %10 = vsyncpa [#allocation3], 0  ;;  %s332_s0 = inlined_call_operand.hbm [shape: f32[8,128], index: 0, kind: input, shape index: {}]   ;;  %s333_s1 = inlined_call_operand.hbm [shape: f32[128,128], index: 1, kind: input, shape index: {}]   ;;  %s334_s2 = inlined_call_operand.vmem [shape: f32[1,128], index: 2, kind: input, shape index: {}]   ;;  %s335_s3 = inlined_call_operand.hbm [shape: f32[128,128], index: 3, kind: input, shape index: {}]   ;;  %s336_s4 = inlined_call_operand.vmem [shape: f32[1,128], index: 4, kind: input, shape index: {}]   ;;  %s337_s5 = inlined_call_operand.hbm [shape: f32[8,128], index: 5, kind: output, shape index: {}]  }
   0x1   :  { %11 = vsyncpa [#allocation6], 0  ;;  %s28_s20 = sshll.u32 %s333_s1, 4  ;;  %s29_s20 = int_to_ptr.hbm [resolvable:$true] %s28_s20 }
   0x2   :  { %12 = vsyncpa [#allocation4], 0  ;;  %s278_s21 = smov [#allocation5]   ;;  %s18_s25 = sshll.u32 %s332_s0, 4  ;;  %s19_s25 = int_to_ptr.hbm [resolvable:$true] %s18_s25 }
   0x3   :  { %s30_s22 = sshll.u32 %s278_s21, 4  ;;  %s279_s26 = smov 128   ;;  %s31_s22 = int_to_ptr.vmem [resolvable:$true] %s30_s22 }
   0x4   :  { %s280_s27 = smov 8   ;;  %s281_s28 = smov [#allocation2]  }
   0x5   :  { %36 = dma.hbm_to_vmem [thread:$0]  %s29_s20, 2048, %s31_s22, [#allocation6], %s279_s26, %s279_s26, %s280_s27  }
   0x6   :  { %s20_s29 = sshll.u32 %s281_s28, 4  ;;  %s43_s7 = sshll.u32 %s335_s3, 4  ;;  %s21_s29 = int_to_ptr.vmem [resolvable:$true] %s20_s29  ;;  %s44_s7 = int_to_ptr.hbm [resolvable:$true] %s43_s7 }
   0x7   :  { %23 = dma.hbm_to_vmem [thread:$0]  %s19_s25, 128, %s21_s29, [#allocation3]  }
   0x8   :  { %s282_s1 = smov [#allocation7]  }
   0x9   :  { %s45_s8 = sshll.u32 %s282_s1, 4  ;;  %s46_s8 = int_to_ptr.vmem [resolvable:$true] %s45_s8 }
   0xa   :  { %51 = dma.hbm_to_vmem [thread:$0]  %s44_s7, 2048, %s46_s8, [#allocation6], %s279_s26, %s279_s26, %s280_s27  }
   0xb   :  { %272 = dma.done.wait [#allocation3], 128  }
   0xc   :  { %273 = vsyncadd [#allocation3], 4294967168 }
   0xd   :  { %274 = dma.done.wait [#allocation6], 4096  }
   0xe   :  { %275 = vsyncadd [#allocation6], 4294963200  ;;  %v82_v0 = vld [vmem:[#allocation5 + $0x78] sm:$0xff]  ;;  %v81_v1 = vld [vmem:[#allocation5 + $0x70] sm:$0xff]  ;;  %s283_s11 = smov [#allocation8]   ;;  %s157_s15 = sshll.u32 %s337_s5, 4  ;;  %s158_s15 = int_to_ptr.hbm [resolvable:$true] %s157_s15 }
   0xf   :  { %87 = vmatpush.msra.mxu0 %v82_v0  ;;  %v80_v2 = vld [vmem:[#allocation5 + $0x68] sm:$0xff]  ;;  %v79_v3 = vld [vmem:[#allocation5 + $0x60] sm:$0xff]  ;;  %v123_v4 = vld [vmem:[#allocation7 + $0x78] sm:$0xff]  ;;  %s155_s12 = sshll.u32 %s283_s11, 4  ;;  %s156_s12 = int_to_ptr.vmem [resolvable:$true] %s155_s12 }
  0x10   :  { %v78_v5 = vld [vmem:[#allocation5 + $0x58] sm:$0xff]  ;;  %128 = vmatpush.msra.mxu1 %v123_v4  ;;  %v122_v6 = vld [vmem:[#allocation7 + $0x70] sm:$0xff]  ;;  %v121_v7 = vld [vmem:[#allocation7 + $0x68] sm:$0xff] }
  0x11   :  { %88 = vmatpush.msra.mxu0 %v81_v1  ;;  %v77_v8 = vld [vmem:[#allocation5 + $0x50] sm:$0xff]  ;;  %v120_v9 = vld [vmem:[#allocation7 + $0x60] sm:$0xff]  ;;  %v76_v10 = vld [vmem:[#allocation5 + $0x48] sm:$0xff] }
  0x12   :  { %129 = vmatpush.msra.mxu1 %v122_v6  ;;  %v119_v11 = vld [vmem:[#allocation7 + $0x58] sm:$0xff]  ;;  %v75_v12 = vld [vmem:[#allocation5 + $0x40] sm:$0xff]  ;;  %v118_v13 = vld [vmem:[#allocation7 + $0x50] sm:$0xff] }
  0x13   :  { %89 = vmatpush.msra.mxu0 %v80_v2  ;;  %v74_v14 = vld [vmem:[#allocation5 + $0x38] sm:$0xff]  ;;  %v117_v15 = vld [vmem:[#allocation7 + $0x48] sm:$0xff]  ;;  %v73_v16 = vld [vmem:[#allocation5 + $0x30] sm:$0xff] }
  0x14   :  { %130 = vmatpush.msra.mxu1 %v121_v7  ;;  %v116_v17 = vld [vmem:[#allocation7 + $0x40] sm:$0xff]  ;;  %v72_v18 = vld [vmem:[#allocation5 + $0x28] sm:$0xff]  ;;  %v115_v19 = vld [vmem:[#allocation7 + $0x38] sm:$0xff] }
  0x15   :  { %90 = vmatpush.msra.mxu0 %v79_v3  ;;  %v71_v20 = vld [vmem:[#allocation5 + $0x20] sm:$0xff]  ;;  %v114_v21 = vld [vmem:[#allocation7 + $0x30] sm:$0xff]  ;;  %v70_v22 = vld [vmem:[#allocation5 + $0x18] sm:$0xff] }
  0x16   :  { %131 = vmatpush.msra.mxu1 %v120_v9  ;;  %v113_v23 = vld [vmem:[#allocation7 + $0x28] sm:$0xff]  ;;  %v69_v24 = vld [vmem:[#allocation5 + $0x10] sm:$0xff]  ;;  %v112_v25 = vld [vmem:[#allocation7 + $0x20] sm:$0xff] }
  0x17   :  { %91 = vmatpush.msra.mxu0 %v78_v5  ;;  %v68_v26 = vld [vmem:[#allocation5 + $0x8] sm:$0xff]  ;;  %v111_v27 = vld [vmem:[#allocation7 + $0x18] sm:$0xff]  ;;  %v67_v28 = vld [vmem:[#allocation5] sm:$0xff] }
  0x18   :  { %132 = vmatpush.msra.mxu1 %v119_v11  ;;  %v66_v29 = vld [vmem:[#allocation2] sm:$0xff]  ;;  %v110_v30 = vld [vmem:[#allocation7 + $0x10] sm:$0xff]  ;;  %v109_v31 = vld [vmem:[#allocation7 + $0x8] sm:$0xff] }
  0x19   :  { %92 = vmatpush.msra.mxu0 %v77_v8  ;;  %v108_v32 = vld [vmem:[#allocation7] sm:$0xff]  ;;  %v174_v33 = vld [vmem:[%s334_s2] ss:$0 sm:$0xff] }
  0x1a   :  { %133 = vmatpush.msra.mxu1 %v118_v13  ;;  %v175_v37 = vld [vmem:[%s336_s4] ss:$0 sm:$0xff] }
  0x1b   :  { %93 = vmatpush.msra.mxu0 %v76_v10 }
  0x1c   :  { %134 = vmatpush.msra.mxu1 %v117_v15 }
  0x1d   :  { %94 = vmatpush.msra.mxu0 %v75_v12 }
  0x1e   :  { %135 = vmatpush.msra.mxu1 %v116_v17 }
  0x1f   :  { %95 = vmatpush.msra.mxu0 %v74_v14 }
  0x20   :  { %136 = vmatpush.msra.mxu1 %v115_v19 }
  0x21   :  { %96 = vmatpush.msra.mxu0 %v73_v16 }
  0x22   :  { %137 = vmatpush.msra.mxu1 %v114_v21 }
  0x23   :  { %97 = vmatpush.msra.mxu0 %v72_v18 }
  0x24   :  { %138 = vmatpush.msra.mxu1 %v113_v23 }
  0x25   :  { %98 = vmatpush.msra.mxu0 %v71_v20 }
  0x26   :  { %139 = vmatpush.msra.mxu1 %v112_v25 }
  0x27   :  { %99 = vmatpush.msra.mxu0 %v70_v22 }
  0x28   :  { %140 = vmatpush.msra.mxu1 %v111_v27 }
  0x29   :  { %100 = vmatpush.msra.mxu0 %v69_v24 }
  0x2a   :  { %141 = vmatpush.msra.mxu1 %v110_v30 }
  0x2b   :  { %101 = vmatpush.msra.mxu0 %v68_v26 }
  0x2c   :  { %142 = vmatpush.msra.mxu1 %v109_v31 }
  0x2d   :  { %102 = vmatpush.msra.mxu0 %v67_v28 }
  0x2e   :  { %103 = vmatmul.f32.vlgmr.msra.gmra.mxu0 %v66_v29  ;;  %143 = vmatpush.msra.mxu1 %v108_v32 }
  0xab   :  { %v104_v34 = vpop.f32.mrf.mxu0 }
  0xac   :  { %v105_v35 = vadd.f32 %v174_v33, %v104_v34 }
  0xae   :  { %v107_v36 = vmax.f32 %v105_v35, 0.0 }
  0xb0   :  { %144 = vmatmul.f32.vlgmr.msra.gmra.mxu1 %v107_v36 }
 0x12d   :  { %v145_v38 = vpop.f32.mrf.mxu1 }
 0x12e   :  { %v146_v39 = vadd.f32 %v175_v37, %v145_v38 }
 0x130   :  { %v148_v40 = vmax.f32 %v146_v39, 0.0 }
 0x132   :  { %149 = vst [vmem:[#allocation8] sm:$0xff] %v148_v40 }
 0x133   :  { %160 = dma.vmem_to_hbm [thread:$0]  %s156_s12, 128, %s158_s15, [#allocation4]  }
 0x134   :  { %276 = dma.done.wait [#allocation4], 128  }
 0x135   :  { %277 = vsyncadd [#allocation4], 4294967168 }
 0x136   :  { %165 = vsyncpa [#allocation3], 1 }
 0x137   :  { %166 = vsyncpa [#allocation6], 1 }
 0x138   :  { %167 = vsyncpa [#allocation4], 1 }

</bundles_post_ra>
